<compile_context>
chip_gen: v7x
topology: tpu7x:2x2x1
jax: 0.10.0
libtpu: 0.0.40
codegen_flags: <defaults>
</compile_context>

<pallas_src>
import math

import jax
import jax.numpy as jnp
from jax.experimental import pallas as pl
from jax.experimental.pallas import tpu as pltpu

_LANE = 128
_SUBLANE = 16  # bf16-friendly sublane granularity for the M (row) axis


def _round_up(x, m):
    return ((x + m - 1) // m) * m


# ----------------------------------------------------------------------------
# Pallas kernels
# ----------------------------------------------------------------------------
def _linear_head_kernel_single_k(x_ref, w_ref, b_ref, o_ref):
    # x_ref: (tm, Kp) f32   w_ref: (Kp, tn) bf16   b_ref: (1, tn) f32
    # Whole K fits in one tile: write the output directly, no scratch needed.
    o_ref[...] = (
        jnp.dot(x_ref[...].astype(jnp.bfloat16), w_ref[...],
                preferred_element_type=jnp.float32)
        + b_ref[...]
    ).astype(o_ref.dtype)


def _linear_head_kernel_multi_k(x_ref, w_ref, b_ref, o_ref, acc_ref):
    # x_ref: (tm, tk) f32   w_ref: (tk, tn) bf16   b_ref: (1, tn) f32
    # acc_ref: (tm, tn) f32 scratch, resident across the K grid axis.
    k = pl.program_id(2)

    @pl.when(k == 0)
    def _init():
        # Fold the bias into the accumulator init (init write happens anyway).
        acc_ref[...] = jnp.broadcast_to(b_ref[...], acc_ref.shape)

    acc_ref[...] += jnp.dot(
        x_ref[...].astype(jnp.bfloat16), w_ref[...],
        preferred_element_type=jnp.float32,
    )

    @pl.when(k == pl.num_programs(2) - 1)
    def _finalize():
        o_ref[...] = acc_ref[...].astype(o_ref.dtype)


# ----------------------------------------------------------------------------
# Tile selection + one-time parameter preparation
# ----------------------------------------------------------------------------
def _choose_tk(K):
    """Prefer tk that divides padded K exactly; collapse K axis when possible."""
    Kr = _round_up(K, _LANE)
    if Kr <= 2048:
        return Kr  # single K step: no accumulator pass, no per-step pl.when
    for cand in range(2048, 511, -_LANE):
        if Kr % cand == 0:
            return cand
    return 1024


def _choose_tn(N):
    """Single N block for small heads so the activation streams from HBM once."""
    Nr = _round_up(N, _LANE)
    if Nr <= 1024:
        return Nr
    return 512


def prepare_head_params(w, b, *, weight_dtype=jnp.bfloat16):
    """Cast + tile-pad the (E, O) weight and (O,) bias once (kept resident)."""
    K, N = w.shape
    tk, tn = _choose_tk(K), _choose_tn(N)
    Kp, Np = _round_up(K, tk), _round_up(N, tn)
    w2 = w.astype(weight_dtype)
    if (Kp, Np) != (K, N):
        w2 = jnp.pad(w2, ((0, Kp - K), (0, Np - N)))
    b2 = b.reshape(1, N).astype(jnp.float32)
    if Np != N:
        b2 = jnp.pad(b2, ((0, 0), (0, Np - N)))
    return dict(w=w2, b=b2, K=K, N=N, Kp=Kp, Np=Np, tk=tk, tn=tn)


# ----------------------------------------------------------------------------
# Wrapper: x [B, S, E] -> [B, S, O]
# ----------------------------------------------------------------------------
def linear_head(x, params, *, out_dtype=None, tm=512):
    B, S, E = x.shape
    K, N = params["K"], params["N"]
    assert E == K, f"embed_dim mismatch: {E} vs {K}"
    Kp, Np, tk, tn = params["Kp"], params["Np"], params["tk"], params["tn"]
    w2, b2 = params["w"], params["b"]

    M = B * S
    out_dtype = x.dtype if out_dtype is None else jnp.dtype(out_dtype)
    obytes = jnp.dtype(out_dtype).itemsize
    multi_k = (Kp // tk) > 1

    # ---- VMEM budget (v7x: 64 MiB/TC; v5e/v6e: 128 MiB physical) ----
    try:
        vmem_cap = int(getattr(pltpu.get_tpu_info(), "vmem_capacity_bytes"))
    except Exception:
        vmem_cap = 64 * 1024 * 1024
    vmem_budget = min(vmem_cap // 2, 48 * 1024 * 1024)

    def vmem_est(tm_):
        est = (
            2 * tm_ * tk * 4       # x tiles: f32 in VMEM (cast in-kernel), dbl-buf
            + 2 * tk * tn * 2      # w tiles: bf16, double-buffered
            + 2 * tm_ * tn * obytes  # output tiles, double-buffered
            + 2 * 8 * tn * 4       # bias tile (sublane-padded), double-buffered
        )
        if multi_k:
            est += tm_ * tn * 4    # f32 accumulator scratch
        return est

    # ---- tm selection ----
    Mr = _round_up(M, _SUBLANE)
    tm = min(tm, Mr)
    tm = _round_up(tm, _SUBLANE)
    while vmem_est(tm) > vmem_budget and tm > 64:
        tm = max(64, tm // 2)

    # v7x megacore: expose >= 2 output blocks on the parallel axes when M allows.
    grid_n = Np // tn
    if (_round_up(M, tm) // tm) * grid_n < 2 and M >= 256:
        tm = _round_up(-(-M // 2), _SUBLANE)

    Mp = _round_up(M, tm)
    grid_m, grid_k = Mp // tm, Kp // tk

    # ---- pad activation only when necessary (no dtype cast in the wrapper) ----
    x2 = x.reshape(M, K)
    if (Mp, Kp) != (M, K):
        # K zero-padding contributes exact zeros; padded M rows are sliced off.
        x2 = jnp.pad(x2, ((0, Mp - M), (0, Kp - K)))

    cost = pl.CostEstimate(
        flops=2 * Mp * Kp * Np,
        transcendentals=0,
        bytes_accessed=(
            Mp * Kp * 4 * grid_n       # x re-streamed once per N block
            + Kp * Np * 2 * grid_m     # w re-streamed once per M block
            + Np * 4                   # bias
            + Mp * Np * obytes         # output writeback
        ),
    )
    vmem_limit = int(min(max(int(1.5 * vmem_est(tm)), 16 * 1024 * 1024),
                         vmem_budget))

    if multi_k:
        out2 = pl.pallas_call(
            _linear_head_kernel_multi_k,
            out_shape=jax.ShapeDtypeStruct((Mp, Np), out_dtype),
            grid_spec=pltpu.PrefetchScalarGridSpec(
                num_scalar_prefetch=0,
                grid=(grid_m, grid_n, grid_k),
                in_specs=[
                    pl.BlockSpec((tm, tk), lambda i, j, k: (i, k)),
                    pl.BlockSpec((tk, tn), lambda i, j, k: (k, j)),
                    pl.BlockSpec((1, tn), lambda i, j, k: (0, j)),
                ],
                out_specs=pl.BlockSpec((tm, tn), lambda i, j, k: (i, j)),
                scratch_shapes=[pltpu.VMEM((tm, tn), jnp.float32)],
            ),
            compiler_params=pltpu.CompilerParams(
                dimension_semantics=("parallel", "parallel", "arbitrary"),
                vmem_limit_bytes=vmem_limit,
            ),
            cost_estimate=cost,
        )(x2, w2, b2)
    else:
        out2 = pl.pallas_call(
            _linear_head_kernel_single_k,
            out_shape=jax.ShapeDtypeStruct((Mp, Np), out_dtype),
            grid_spec=pltpu.PrefetchScalarGridSpec(
                num_scalar_prefetch=0,
                grid=(grid_m, grid_n),
                in_specs=[
                    pl.BlockSpec((tm, Kp), lambda i, j: (i, 0)),
                    pl.BlockSpec((Kp, tn), lambda i, j: (0, j)),
                    pl.BlockSpec((1, tn), lambda i, j: (0, j)),
                ],
                out_specs=pl.BlockSpec((tm, tn), lambda i, j: (i, j)),
            ),
            compiler_params=pltpu.CompilerParams(
                dimension_semantics=("parallel", "parallel"),
                vmem_limit_bytes=vmem_limit,
            ),
            cost_estimate=cost,
        )(x2, w2, b2)

    return out2[:M, :N].reshape(B, S, N)


# ----------------------------------------------------------------------------
# JAX-side model mirroring BaseGETModel's concrete surface.
# ----------------------------------------------------------------------------
class BaseGETModelPallas:
    def __init__(self, embed_dim, loss_specification=None, stats_specification=None):
        self.embed_dim = embed_dim
        self.loss_specification = loss_specification
        self.stats_specification = stats_specification
        self.output_dim = 0
        self.head_w = None          # (E, O) f32 master copy (xavier_uniform_)
        self.head_b = None          # (O,) zeros
        self._head_params = None    # bf16-cast, tile-padded, cached

    def reset_head(self, output_dim, global_pool="", key=None):
        # nn.Linear(embed_dim, output_dim) + _init_weights:
        #   xavier_uniform_(weight), bias = 0.   output_dim <= 0 -> Identity.
        self.output_dim = output_dim
        if output_dim > 0:
            key = jax.random.PRNGKey(0) if key is None else key
            fan_in, fan_out = self.embed_dim, output_dim
            bound = math.sqrt(6.0 / (fan_in + fan_out))
            # stored already transposed to (E, O) for x @ W
            self.head_w = jax.random.uniform(
                key, (fan_in, fan_out), dtype=jnp.float32,
                minval=-bound, maxval=bound)
            self.head_b = jnp.zeros((fan_out,), dtype=jnp.float32)
            # cast + pad ONCE; reused for every apply_head call.
            self._head_params = prepare_head_params(self.head_w, self.head_b)
        else:
            self.head_w = self.head_b = self._head_params = None

    def apply_head(self, x, *, out_dtype=None, force_pallas=False):
        if self.output_dim <= 0:
            return x  # nn.Identity()
        B, S, E = x.shape
        # Tiny heads: pallas_call is pure dispatch/DMA overhead -> plain XLA dot
        # (same bf16-input / f32-accumulate recipe as the Pallas path).
        if not force_pallas and (B * S) * E * self.output_dim < (1 << 18):
            w_bf16 = self._head_params["w"][:E, : self.output_dim]
            y = jnp.dot(
                x.reshape(B * S, E).astype(jnp.bfloat16), w_bf16,
                preferred_element_type=jnp.float32,
            ) + self.head_b
            return y.astype(out_dtype or x.dtype).reshape(B, S, self.output_dim)
        return linear_head(x, self._head_params, out_dtype=out_dtype)

    # TODO(synk): data_prep/forward/before_loss/loss_fn/test_stats/
    # global_test_stats raise NotImplementedError in the PyTorch base class;
    # nothing concrete to translate.


if __name__ == "__main__":
    # --- Small demo consistent with the module: batch=2, seq=8, embed_dim=32 ---
    B, S, E, O = 2, 8, 32, 16
    key = jax.random.PRNGKey(0)
    kx, kw, kx2, kw2 = jax.random.split(key, 4)
    x = jax.random.normal(kx, (B, S, E), dtype=jnp.float32)

    model = BaseGETModelPallas(embed_dim=E)
    model.reset_head(O, key=kw)

    y = model.apply_head(x, force_pallas=True)    # exercises the single-K kernel
    y = jax.block_until_ready(y)
    assert y.shape == (B, S, O)

    # Reference with the same bf16-input / f32-accumulate recipe.
    ref = jnp.dot(
        x.reshape(B * S, E).astype(jnp.bfloat16),
        model.head_w.astype(jnp.bfloat16),
        preferred_element_type=jnp.float32,
    ) + model.head_b
    ref = ref.reshape(B, S, O)
    assert jnp.allclose(y, ref, atol=1e-3, rtol=1e-3), "small-shape mismatch"

    # --- Larger check: multi-tile grid + K accumulation (tk=1536 -> 2 K steps) ---
    B2, S2, E2, O2 = 2, 512, 3072, 256
    x_big = jax.random.normal(kx2, (B2, S2, E2), dtype=jnp.float32)
    bound = math.sqrt(6.0 / (E2 + O2))
    w_big = jax.random.uniform(kw2, (E2, O2), dtype=jnp.float32,
                               minval=-bound, maxval=bound)
    b_big = jnp.full((O2,), 0.25, dtype=jnp.float32)   # nonzero: checks bias fold
    params_big = prepare_head_params(w_big, b_big)

    y_big = jax.block_until_ready(linear_head(x_big, params_big))
    assert y_big.shape == (B2, S2, O2)

    ref_big = jnp.dot(
        x_big.reshape(B2 * S2, E2).astype(jnp.bfloat16),
        w_big.astype(jnp.bfloat16),
        preferred_element_type=jnp.float32,
    ) + b_big
    ref_big = ref_big.reshape(B2, S2, O2)
    assert jnp.allclose(y_big, ref_big, atol=5e-3, rtol=5e-3), "tiled mismatch"

    print("KERNEL_OK")
</pallas_src>

<mosaic_0001>
module attributes {stable_mosaic.version = 11 : i64} {
  func.func @_linear_head_kernel_single_k(%arg0: i32, %arg1: i32, %arg2: memref<16x128xf32, #tpu.memory_space<vmem>>, %arg3: memref<128x128xbf16, #tpu.memory_space<vmem>>, %arg4: memref<1x128xf32, #tpu.memory_space<vmem>>, %arg5: memref<16x128xf32, #tpu.memory_space<vmem>>) attributes {dimension_semantics = [#tpu.dimension_semantics<parallel>, #tpu.dimension_semantics<parallel>], iteration_bounds = array<i64: 1, 1>, scalar_prefetch = 0 : i64, scratch_operands = 0 : i64, tpu.core_type = #tpu.core_type<tc>, window_params = [{transform_indices = @transform_0, window_bounds = array<i64: 16, 128>}, {transform_indices = @transform_1, window_bounds = array<i64: 128, 128>}, {transform_indices = @transform_2, window_bounds = array<i64: 1, 128>}, {transform_indices = @transform_3, window_bounds = array<i64: 16, 128>}]} {
    %c0 = arith.constant 0 : index
    %c0_0 = arith.constant 0 : index
    %0 = vector.load %arg2[%c0, %c0_0] : memref<16x128xf32, #tpu.memory_space<vmem>>, vector<16x128xf32>
    %1 = arith.truncf %0 : vector<16x128xf32> to vector<16x128xbf16>
    %c0_1 = arith.constant 0 : index
    %c0_2 = arith.constant 0 : index
    %2 = vector.load %arg3[%c0_1, %c0_2] : memref<128x128xbf16, #tpu.memory_space<vmem>>, vector<128x128xbf16>
    %cst = arith.constant dense<0.000000e+00> : vector<16x128xf32>
    %3 = tpu.matmul %1, %2, %cst {dimension_numbers = #tpu.dot_dimension_numbers<[1], [0], [0], [1], [0, 0, 1, 1], [], []>} : vector<16x128xbf16>, vector<128x128xbf16>, vector<16x128xf32> -> vector<16x128xf32>
    %c0_3 = arith.constant 0 : index
    %c0_4 = arith.constant 0 : index
    %4 = vector.load %arg4[%c0_3, %c0_4] : memref<1x128xf32, #tpu.memory_space<vmem>>, vector<1x128xf32>
    %5 = vector.broadcast %4 : vector<1x128xf32> to vector<16x128xf32>
    %6 = arith.addf %3, %5 : vector<16x128xf32>
    %c0_5 = arith.constant 0 : index
    %c0_6 = arith.constant 0 : index
    %7 = vector.load %arg5[%c0_5, %c0_6] : memref<16x128xf32, #tpu.memory_space<vmem>>, vector<16x128xf32>
    tpu.vector_store %arg5[%c0_5, %c0_6], %6 {strides = array<i32>} : memref<16x128xf32, #tpu.memory_space<vmem>>, vector<16x128xf32>,
    return
  }
  func.func @transform_0(%arg0: i32, %arg1: i32) -> (i32, i32) {
    %c0_i32 = arith.constant 0 : i32
    %c0_i32_0 = arith.constant 0 : i32
    return %arg0, %c0_i32 : i32, i32
  }
  func.func @transform_1(%arg0: i32, %arg1: i32) -> (i32, i32) {
    %c0_i32 = arith.constant 0 : i32
    %c0_i32_0 = arith.constant 0 : i32
    return %c0_i32, %arg1 : i32, i32
  }
  func.func @transform_2(%arg0: i32, %arg1: i32) -> (i32, i32) {
    %c0_i32 = arith.constant 0 : i32
    %c0_i32_0 = arith.constant 0 : i32
    return %c0_i32, %arg1 : i32, i32
  }
  func.func @transform_3(%arg0: i32, %arg1: i32) -> (i32, i32) {
    %c0_i32 = arith.constant 0 : i32
    return %arg0, %arg1 : i32, i32
  }
}

</mosaic_0001>

<bundles_post_ra>
// kernel: tpu_custom_call.1
= control target key start
LH: loop header
LB: loop body
LE: loop exit
PB: predicated region body
PF: predicated region fallthrough
CT: control target
= control target key end

     0   :  { %8 = vsyncpa [#allocation3], 0  ;;  %s380_s0 = inlined_call_operand.hbm [shape: f32[16,128], index: 0, kind: input, shape index: {}]   ;;  %s381_s1 = inlined_call_operand.hbm [shape: bf16[128,128], index: 1, kind: input, shape index: {}]   ;;  %s382_s2 = inlined_call_operand.vmem [shape: f32[1,128], index: 2, kind: input, shape index: {}]   ;;  %s383_s3 = inlined_call_operand.hbm [shape: f32[16,128], index: 3, kind: output, shape index: {}]  }
   0x1   :  { %9 = vsyncpa [#allocation6], 0 }
   0x2   :  { %10 = vsyncpa [#allocation4], 0  ;;  %s306_s12 = smov [#allocation2]   ;;  %s234_s16 = scalar_lea.hbm %s380_s0, 256 }
   0x3   :  { %s16_s13 = sshll.u32 %s306_s12, 4  ;;  %p235_p0 = scmp.ne.s32.totalorder %s380_s0, %s234_s16  ;;  %s17_s13 = int_to_ptr.vmem [resolvable:$true] %s16_s13 }
   0x4   :  { %p238_p1 = scmp.lt.u32.totalorder %s234_s16, %s380_s0 }
   0x6   :  { %p240_p2 = pnand %p238_p1, %p235_p0 }
   0x8   :  { %243 = shalt.err (!%p240_p2)
}
   0x9   :  { %s244_s21 = scalar_lea.vmem %s17_s13, 256  ;;  %p249_p4 = scmp.lt.s32.totalorder %s17_s13, %s17_s13 }
   0xa   :  { %p245_p3 = scmp.ne.s32.totalorder %s17_s13, %s244_s21  ;;  %p250_p5 = scmp.lt.s32.totalorder %s244_s21, %s244_s21 }
   0xc   :  { %p251_p6 = por %p250_p5, %p249_p4 }
   0xe   :  { %p252_p7 = pnand %p251_p6, %p245_p3 }
  0x10   :  { %255 = shalt.err (!%p252_p7)
}
  0x11   :  { %s307_s22 = smov 128   ;;  %s308_s23 = smov 8  }
  0x12   :  { %22 = dma.hbm_to_vmem [thread:$0]  %s380_s0, 256, %s17_s13, [#allocation3], %s307_s22, %s307_s22, %s308_s23  }
  0x13   :  { %s309_s26 = smov [#allocation5]   ;;  %s256_s30 = scalar_lea.hbm %s381_s1, 1024 }
  0x14   :  { %s28_s27 = sshll.u32 %s309_s26, 4  ;;  %p257_p8 = scmp.ne.s32.totalorder %s381_s1, %s256_s30  ;;  %s29_s27 = int_to_ptr.vmem [resolvable:$true] %s28_s27 }
  0x15   :  { %p260_p9 = scmp.lt.u32.totalorder %s256_s30, %s381_s1 }
  0x17   :  { %p262_p10 = pnand %p260_p9, %p257_p8 }
  0x19   :  { %265 = shalt.err (!%p262_p10)
}
  0x1a   :  { %s266_s8 = scalar_lea.vmem %s29_s27, 1024  ;;  %p271_p12 = scmp.lt.s32.totalorder %s29_s27, %s29_s27 }
  0x1b   :  { %p267_p11 = scmp.ne.s32.totalorder %s29_s27, %s266_s8  ;;  %p272_p13 = scmp.lt.s32.totalorder %s266_s8, %s266_s8 }
  0x1d   :  { %p273_p0 = por %p272_p13, %p271_p12 }
  0x1f   :  { %p274_p1 = pnand %p273_p0, %p267_p11 }
  0x21   :  { %277 = shalt.err (!%p274_p1)
}
  0x22   :  { %s310_s0 = smov 64   ;;  %s311_s9 = smov 4  }
  0x23   :  { %34 = dma.hbm_to_vmem [thread:$0]  %s381_s1, 1024, %s29_s27, [#allocation6], %s310_s0, %s310_s0, %s311_s9  }
  0x24   :  { %300 = dma.done.wait [#allocation3], 256  }
  0x25   :  { %301 = vsyncadd [#allocation3], 4294967040 }
  0x26   :  { %302 = dma.done.wait [#allocation6], 1024  }
  0x27   :  { %303 = vsyncadd [#allocation6], 4294966272  ;;  %v312_v0 = vmov 0.0   ;;  %vm313_vm0 = vmmov 0   ;;  %v226_v1 = vld [vmem:[#allocation5] sm:$0xff]   ;;  %v227_v2 = vld [vmem:[#allocation5 + $0x8] sm:$0xff]  }
  0x28   :  { %197 = vmatprep.subr.bf16.mxu0 %v312_v0  ;;  %213 = vmatprep.mubr.msk.bf16.mxu0 %vm313_vm0, %v312_v0  ;;  %v228_v3 = vld [vmem:[#allocation5 + $0x10] sm:$0xff]   ;;  %v229_v4 = vld [vmem:[#allocation5 + $0x18] sm:$0xff]   ;;  %v230_v5 = vld [vmem:[#allocation5 + $0x20] sm:$0xff]   ;;  %s314_s13 = smov [#allocation7]  }
  0x29   :  { %198 = vmatpush3.bf16.msra.mxu0 %v226_v1  ;;  %v231_v6 = vld [vmem:[#allocation5 + $0x28] sm:$0xff]   ;;  %v232_v7 = vld [vmem:[#allocation5 + $0x30] sm:$0xff]   ;;  %v233_v8 = vld [vmem:[#allocation5 + $0x38] sm:$0xff]   ;;  %s166_s14 = sshll.u32 %s314_s13, 4  ;;  %s167_s14 = int_to_ptr.vmem [resolvable:$true] %s166_s14 }
  0x2a   :  { %199 = vmatprep.subr.bf16.mxu0 %v312_v0  ;;  %v44_v9 = vld [vmem:[#allocation2] sm:$0xff]  ;;  %v45_v10 = vld [vmem:[#allocation2 + $0x8] sm:$0xff]  ;;  %s278_s15 = scalar_lea.vmem %s167_s14, 256  ;;  %p283_p3 = scmp.lt.s32.totalorder %s167_s14, %s167_s14 }
  0x2b   :  { %v46_v11 = vpack.c.bf16 %v45_v10, %v44_v9  ;;  %v179_v12 = vld [vmem:[%s382_s2] ss:$0 sm:$0xff]  ;;  %p279_p2 = scmp.ne.s32.totalorder %s167_s14, %s278_s15  ;;  %p284_p4 = scmp.lt.s32.totalorder %s278_s15, %s278_s15 }
  0x2d   :  { %200 = vmatpush3.bf16.msra.mxu0 %v227_v2  ;;  %p285_p5 = por %p284_p4, %p283_p3 }
  0x2e   :  { %201 = vmatprep.subr.bf16.mxu0 %v312_v0 }
  0x2f   :  { %p286_p6 = pnand %p285_p5, %p279_p2 }
  0x31   :  { %202 = vmatpush3.bf16.msra.mxu0 %v228_v3 }
  0x32   :  { %203 = vmatprep.subr.bf16.mxu0 %v312_v0 }
  0x35   :  { %204 = vmatpush3.bf16.msra.mxu0 %v229_v4 }
  0x36   :  { %205 = vmatprep.subr.bf16.mxu0 %v312_v0 }
  0x39   :  { %206 = vmatpush3.bf16.msra.mxu0 %v230_v5 }
  0x3a   :  { %207 = vmatprep.subr.bf16.mxu0 %v312_v0 }
  0x3d   :  { %208 = vmatpush3.bf16.msra.mxu0 %v231_v6 }
  0x3e   :  { %209 = vmatprep.subr.bf16.mxu0 %v312_v0 }
  0x41   :  { %210 = vmatpush3.bf16.msra.mxu0 %v232_v7 }
  0x42   :  { %211 = vmatprep.subr.bf16.mxu0 %v312_v0 }
  0x45   :  { %212 = vmatpush3.bf16.msra.mxu0 %v233_v8 }
  0x48   :  { %214 = vmatmul.mubr.bf16.vlgmr.msra.gmra.mrb[0].mxu0 %v46_v11 }
 0x11b   :  { %v152_v13 = vpop.f32.mrb[0].mxu0 }
 0x11c   :  { %v153_v14 = vadd.f32 %v179_v12, %v152_v13  ;;  %v215_v15 = vpop.f32.mrb[1].mxu0 }
 0x11d   :  { %v155_v16 = vpop.f32.mrb[2].mxu0 }
 0x11e   :  { %159 = vst [vmem:[#allocation7] sm:$0xff] %v153_v14  ;;  %v156_v17 = vadd.f32 %v179_v12, %v155_v16  ;;  %v216_v18 = vpop.f32.mrb[3].mxu0 }
 0x120   :  { %160 = vst [vmem:[#allocation7 + $0x8] sm:$0xff] %v156_v17 }
 0x121   :  { %289 = shalt.err (!%p286_p6)
}
 0x122   :  { %s290_s17 = scalar_lea.hbm %s383_s3, 256 }
 0x123   :  { %p291_p7 = scmp.ne.s32.totalorder %s383_s3, %s290_s17  ;;  %p294_p8 = scmp.lt.u32.totalorder %s290_s17, %s383_s3 }
 0x125   :  { %p296_p9 = pnand %p294_p8, %p291_p7 }
 0x127   :  { %299 = shalt.err (!%p296_p9)
}
 0x128   :  { %172 = dma.vmem_to_hbm [thread:$0]  %s167_s14, 256, %s383_s3, [#allocation4], %s307_s22, %s307_s22, %s308_s23  }
 0x129   :  { %304 = dma.done.wait [#allocation4], 256  }
 0x12a   :  { %305 = vsyncadd [#allocation4], 4294967040 }
 0x12b   :  { %176 = vsyncpa [#allocation3], 1 }
 0x12c   :  { %177 = vsyncpa [#allocation6], 1 }
 0x12d   :  { %178 = vsyncpa [#allocation4], 1 }

</bundles_post_ra>
